<compile_context>
chip_gen: v7x
topology: tpu7x:2x2x1
jax: 0.10.0
libtpu: 0.0.40
codegen_flags: <defaults>
</compile_context>

<pallas_src>
import jax
import jax.numpy as jnp
from jax.experimental import pallas as pl
from jax.experimental.pallas import tpu as pltpu


_ONE_HOT_MAX_VOCAB = 1024            # resident tables up to this vocab use the MXU one-hot gather
_SINGLE_BUFFER_MIN_TABLE = 4 << 20   # single-buffer the resident table only once it is worth it
_MAX_SMEM_IDX_TOKENS = 32768         # cap scalar-prefetched indices per call (SMEM pow2 padding)


def _round_up(x: int, m: int) -> int:
    return ((x + m - 1) // m) * m


def _vmem_capacity_bytes() -> int:
    # Generation-aware VMEM budget (64 MiB/TC on v7x, 128 MiB on v5e/v6e).
    try:
        return int(pltpu.get_tpu_info().vmem_capacity_bytes)
    except Exception:
        return 64 << 20  # conservative fallback: v7x per-TensorCore VMEM


def _choose_tb(num_tokens: int, row_bytes: int, sub: int, target_bytes: int, cap: int) -> int:
    rows = max(sub, (target_bytes // row_bytes) // sub * sub)
    tb = min(cap, rows, _round_up(num_tokens, sub))
    return max(sub, (tb // sub) * sub)


# ----------------------------------------------------------------------------
# Kernels
# ----------------------------------------------------------------------------

def _onehot_gather_kernel(idx_ref, w_ref, o_ref):
    """Resident small-vocab gather: one-hot(ids) @ table on the (idle) MXU.

    idx_ref: VMEM (tb, 1) int32   blocked indices for this step
    w_ref:   VMEM (vocab, Vp)     resident table (constant index_map)
    o_ref:   VMEM (tb, Vp)        output tile (one unmasked store)
    """
    tb = o_ref.shape[0]
    vocab = w_ref.shape[0]
    ids = idx_ref[...]                                            # (tb, 1)
    cols = jax.lax.broadcasted_iota(jnp.int32, (tb, vocab), 1)    # (tb, vocab)
    onehot = (cols == ids).astype(w_ref.dtype)                    # exact 0/1 rows
    o_ref[...] = jnp.dot(
        onehot, w_ref[...], preferred_element_type=jnp.float32
    ).astype(o_ref.dtype)


def _rowcopy_gather_kernel(idx_ref, w_ref, o_ref):
    """Resident large-vocab gather: 8 dynamic row reads -> one unmasked (8, Vp) store.

    idx_ref: SMEM int32[chunk_tokens] (scalar prefetch)
    w_ref:   VMEM (vocab, Vp)         resident table
    o_ref:   VMEM (tb, Vp)
    """
    i = pl.program_id(0)
    tb = o_ref.shape[0]
    base = i * tb  # hoisted out of the loop

    @pl.loop(0, tb // 8)
    def _(g):
        start = pl.multiple_of(g * 8, 8)
        # Statically unrolled group of 8 dynamic-sublane reads, assembled into
        # a full-sublane (8, Vp) tile so the store is unmasked.
        rows = [w_ref[pl.ds(idx_ref[base + start + r], 1), :] for r in range(8)]
        o_ref[pl.ds(start, 8), :] = jnp.concatenate(rows, axis=0)


def _streamed_gather_kernel(idx_ref, w_hbm_ref, o_ref, sem_ref):
    """HBM-streamed gather: per-row DMAs land directly in the output tile.

    idx_ref:   SMEM int32[chunk_tokens] (scalar prefetch)
    w_hbm_ref: HBM (vocab, Vp)          (memory_space=pl.ANY)
    o_ref:     VMEM (tb, Vp)            output tile = DMA destination
    sem_ref:   DMA semaphore, shape (1,)

    Each grid step is self-contained (issue + single wait, no cross-step
    carry), so the grid axis can be "parallel" and both v7x TensorCores
    issue row DMAs. Pallas's own output double-buffering still overlaps this
    step's gather with the previous step's HBM writeback.
    """
    # TODO(synk): coalesce duplicate/contiguous rows into multi-row DMAs
    # (sort/bucket indices in the wrapper) to beat the per-descriptor cost.
    i = pl.program_id(0)
    tb = o_ref.shape[0]
    base = i * tb  # hoisted

    group = 4  # partially unrolled descriptor issue

    @pl.loop(0, tb // group)
    def _(g):
        t0 = g * group
        for r in range(group):
            row = idx_ref[base + t0 + r]
            pltpu.make_async_copy(
                w_hbm_ref.at[pl.ds(row, 1), :],
                o_ref.at[pl.ds(t0 + r, 1), :],
                sem_ref.at[0],
            ).start()

    # Single wait draining the whole tile's worth of bytes: tb row copies of
    # Vp*itemsize bytes each, all signalling sem_ref[0].
    pltpu.make_async_copy(o_ref, o_ref, sem_ref.at[0]).wait()


# ----------------------------------------------------------------------------
# Wrapper
# ----------------------------------------------------------------------------

def embedding_lookup(weights: jax.Array, indices: jax.Array,
                     *, force_path: str | None = None) -> jax.Array:
    """Pallas equivalent of `weights[indices]` (torch.nn.Embedding forward).

    force_path: None (auto) | "onehot" | "rowcopy" | "streamed"  (testing knob)
    """
    # TODO(synk): torch raises on out-of-range indices; we clamp instead
    # (no clean way to raise from inside a TPU kernel).
    word_size, vector_size = weights.shape
    dtype = weights.dtype
    itemsize = jnp.dtype(dtype).itemsize
    sub = {4: 8, 2: 16, 1: 32}.get(itemsize, 8)

    flat_idx = indices.reshape(-1).astype(jnp.int32)
    num_tokens = int(flat_idx.shape[0])
    if num_tokens == 0:
        return jnp.zeros(indices.shape + (vector_size,), dtype=dtype)

    flat_idx = jnp.clip(flat_idx, 0, word_size - 1)

    # Lane-pad the embedding dim to a multiple of 128 for full-width transfers.
    vp = _round_up(vector_size, 128)
    w = weights if vp == vector_size else jnp.pad(weights, ((0, 0), (0, vp - vector_size)))
    row_bytes = vp * itemsize
    table_bytes = word_size * row_bytes

    vmem_cap = _vmem_capacity_bytes()
    # Single-buffer the resident table (constant index_map -> a second buffer
    # is pure waste) once it is big enough to matter; the tiny-table path
    # keeps the default buffering.
    tbl_bufs = 1 if table_bytes > _SINGLE_BUFFER_MIN_TABLE else 2

    # Resident-path token block: ~2 MiB output tiles (>=85% of HBM roofline),
    # bounded so the one-hot LHS temp stays ~<=2 MiB for small vocabs.
    tb_res = _choose_tb(num_tokens, row_bytes, sub, target_bytes=2 << 20, cap=4096)
    use_onehot = word_size <= _ONE_HOT_MAX_VOCAB
    onehot_tmp = 0
    if use_onehot:
        tb_res = min(tb_res, max(sub, ((2 << 20) // (word_size * 4)) // sub * sub))
        onehot_tmp = 2 * tb_res * word_size * 4

    working = 2 * tb_res * row_bytes + onehot_tmp + (8 << 20)
    resident_fits = tbl_bufs * table_bytes + working <= int(0.9 * vmem_cap)

    if force_path is not None:
        path = force_path
    else:
        path = ("onehot" if use_onehot else "rowcopy") if resident_fits else "streamed"

    def table_spec(with_prefetch_arg: bool) -> pl.BlockSpec:
        kw = {}
        if tbl_bufs == 1:
            kw["pipeline_mode"] = pl.Buffered(1)
        if with_prefetch_arg:
            return pl.BlockSpec((word_size, vp), lambda i, ids: (0, 0), **kw)
        return pl.BlockSpec((word_size, vp), lambda i: (0, 0), **kw)

    if path == "onehot":
        tb = tb_res
        padded = _round_up(num_tokens, tb)
        idx = flat_idx if padded == num_tokens else jnp.pad(flat_idx, (0, padded - num_tokens))
        idx2d = idx.reshape(padded, 1)   # blocked VMEM input; no SMEM size limit
        nblk = padded // tb

        cost = pl.CostEstimate(
            flops=2 * padded * word_size * vp,
            transcendentals=0,
            bytes_accessed=int(table_bytes + padded * row_bytes + padded * 4),
        )
        vmem_needed = (tbl_bufs * table_bytes + 2 * tb * row_bytes
                       + onehot_tmp + 2 * tb * 4 + (4 << 20))
        out = pl.pallas_call(
            _onehot_gather_kernel,
            out_shape=jax.ShapeDtypeStruct((padded, vp), dtype),
            grid_spec=pltpu.PrefetchScalarGridSpec(
                num_scalar_prefetch=0,
                grid=(nblk,),
                in_specs=[pl.BlockSpec((tb, 1), lambda i: (i, 0)),
                          table_spec(False)],
                out_specs=pl.BlockSpec((tb, vp), lambda i: (i, 0)),
            ),
            compiler_params=pltpu.CompilerParams(
                dimension_semantics=("parallel",),
                vmem_limit_bytes=int(min(vmem_cap, max(vmem_needed, 32 << 20))),
            ),
            cost_estimate=cost,
        )(idx2d, w)
    else:
        if path == "rowcopy":
            tb = tb_res
        else:  # streamed: descriptor-issue bound; 512 in-flight rows is plenty
            tb = _choose_tb(num_tokens, row_bytes, sub, target_bytes=1 << 20, cap=512)

        padded = _round_up(num_tokens, tb)
        idx = flat_idx if padded == num_tokens else jnp.pad(flat_idx, (0, padded - num_tokens))

        def run_chunk(cur_idx):
            n = int(cur_idx.shape[0])
            nblk = n // tb
            if path == "rowcopy":
                cost = pl.CostEstimate(
                    flops=0, transcendentals=0,
                    bytes_accessed=int(table_bytes + n * row_bytes + n * 4))
                vmem_needed = tbl_bufs * table_bytes + 2 * tb * row_bytes + (4 << 20)
                return pl.pallas_call(
                    _rowcopy_gather_kernel,
                    out_shape=jax.ShapeDtypeStruct((n, vp), dtype),
                    grid_spec=pltpu.PrefetchScalarGridSpec(
                        num_scalar_prefetch=1,
                        grid=(nblk,),
                        in_specs=[table_spec(True)],
                        out_specs=pl.BlockSpec((tb, vp), lambda i, ids: (i, 0)),
                    ),
                    compiler_params=pltpu.CompilerParams(
                        dimension_semantics=("parallel",),
                        vmem_limit_bytes=int(min(vmem_cap, max(vmem_needed, 32 << 20))),
                    ),
                    cost_estimate=cost,
                )(cur_idx, w)
            else:  # streamed
                cost = pl.CostEstimate(
                    flops=0, transcendentals=0,
                    bytes_accessed=int(2 * n * row_bytes + n * 4))
                vmem_needed = 2 * tb * row_bytes + (4 << 20)
                return pl.pallas_call(
                    _streamed_gather_kernel,
                    out_shape=jax.ShapeDtypeStruct((n, vp), dtype),
                    grid_spec=pltpu.PrefetchScalarGridSpec(
                        num_scalar_prefetch=1,
                        grid=(nblk,),
                        in_specs=[pl.BlockSpec(memory_space=pl.ANY)],
                        out_specs=pl.BlockSpec((tb, vp), lambda i, ids: (i, 0)),
                        scratch_shapes=[pltpu.SemaphoreType.DMA((1,))],
                    ),
                    compiler_params=pltpu.CompilerParams(
                        dimension_semantics=("parallel",),
                        vmem_limit_bytes=int(min(vmem_cap, max(vmem_needed, 32 << 20))),
                    ),
                    cost_estimate=cost,
                )(cur_idx, w)

        # Chunk the scalar-prefetched index vector so SMEM (next-pow2 padded)
        # never overflows, no matter how many tokens are requested.
        chunk = max(tb, (_MAX_SMEM_IDX_TOKENS // tb) * tb)
        pieces = [run_chunk(idx[s:min(s + chunk, padded)]) for s in range(0, padded, chunk)]
        out = pieces[0] if len(pieces) == 1 else jnp.concatenate(pieces, axis=0)

    out = out[:num_tokens, :vector_size]
    return out.reshape(indices.shape + (vector_size,))


if __name__ == "__main__":
    word_size = 64
    vector_size = 128

    key = jax.random.PRNGKey(0)
    k_w, k_i = jax.random.split(key)

    # Deterministic "randn"-style parameter init (synthetic, not a checkpoint).
    weights = jax.random.normal(k_w, (word_size, vector_size), dtype=jnp.float32)
    # Small index tensor: batch=2, seq=8.
    indices = jax.random.randint(k_i, (2, 8), minval=0, maxval=word_size, dtype=jnp.int32)

    ref = weights[indices]

    # Exercise all three paths on the same inputs:
    #   None      -> resident one-hot MXU gather (the path a 64x128 table takes)
    #   "rowcopy" -> resident large-vocab gather (grouped unmasked stores)
    #   "streamed"-> HBM per-row DMA gather (table-too-big-for-VMEM path)
    for path in (None, "rowcopy", "streamed"):
        out = jax.block_until_ready(embedding_lookup(weights, indices, force_path=path))
        name = path or "onehot"
        assert out.shape == (2, 8, vector_size), (name, out.shape)
        assert out.dtype == jnp.float32, (name, out.dtype)
        assert jnp.allclose(out, ref), f"mismatch vs reference gather ({name})"

    print("KERNEL_OK")
</pallas_src>

<mosaic_0001>
module attributes {stable_mosaic.version = 11 : i64} {
  func.func @_onehot_gather_kernel(%arg0: i32, %arg1: memref<16x1xi32, #tpu.memory_space<vmem>>, %arg2: memref<64x128xf32, #tpu.memory_space<vmem>>, %arg3: memref<16x128xf32, #tpu.memory_space<vmem>>) attributes {dimension_semantics = [#tpu.dimension_semantics<parallel>], iteration_bounds = array<i64: 1>, scalar_prefetch = 0 : i64, scratch_operands = 0 : i64, tpu.core_type = #tpu.core_type<tc>, window_params = [{transform_indices = @transform_0, window_bounds = array<i64: 16, 1>}, {pipeline_mode = #tpu.pipeline_mode<synchronous>, transform_indices = @transform_1, window_bounds = array<i64: 64, 128>}, {transform_indices = @transform_2, window_bounds = array<i64: 16, 128>}]} {
    %c0 = arith.constant 0 : index
    %c0_0 = arith.constant 0 : index
    %0 = vector.load %arg1[%c0, %c0_0] : memref<16x1xi32, #tpu.memory_space<vmem>>, vector<16x1xi32>
    %1 = tpu.iota {dimensions = array<i32: 1>} : vector<16x64xi32>
    %2 = vector.broadcast %0 : vector<16x1xi32> to vector<16x64xi32>
    %3 = arith.cmpi eq, %1, %2 : vector<16x64xi32>
    %4 = arith.extui %3 : vector<16x64xi1> to vector<16x64xi32>
    %5 = arith.sitofp %4 : vector<16x64xi32> to vector<16x64xf32>
    %c0_1 = arith.constant 0 : index
    %c0_2 = arith.constant 0 : index
    %6 = vector.load %arg2[%c0_1, %c0_2] : memref<64x128xf32, #tpu.memory_space<vmem>>, vector<64x128xf32>
    %cst = arith.constant dense<0.000000e+00> : vector<16x128xf32>
    %7 = tpu.matmul %5, %6, %cst {dimension_numbers = #tpu.dot_dimension_numbers<[1], [0], [0], [1], [0, 0, 1, 1], [], []>} : vector<16x64xf32>, vector<64x128xf32>, vector<16x128xf32> -> vector<16x128xf32>
    %c0_3 = arith.constant 0 : index
    %c0_4 = arith.constant 0 : index
    %8 = vector.load %arg3[%c0_3, %c0_4] : memref<16x128xf32, #tpu.memory_space<vmem>>, vector<16x128xf32>
    tpu.vector_store %arg3[%c0_3, %c0_4], %7 {strides = array<i32>} : memref<16x128xf32, #tpu.memory_space<vmem>>, vector<16x128xf32>,
    return
  }
  func.func @transform_0(%arg0: i32) -> (i32, i32) {
    %c0_i32 = arith.constant 0 : i32
    %c0_i32_0 = arith.constant 0 : i32
    return %arg0, %c0_i32 : i32, i32
  }
  func.func @transform_1(%arg0: i32) -> (i32, i32) {
    %c0_i32 = arith.constant 0 : i32
    %c0_i32_0 = arith.constant 0 : i32
    %c0_i32_1 = arith.constant 0 : i32
    return %c0_i32, %c0_i32_0 : i32, i32
  }
  func.func @transform_2(%arg0: i32) -> (i32, i32) {
    %c0_i32 = arith.constant 0 : i32
    %c0_i32_0 = arith.constant 0 : i32
    return %arg0, %c0_i32 : i32, i32
  }
}

</mosaic_0001>

<bundles_post_ra>
// kernel: tpu_custom_call.1
= control target key start
LH: loop header
LB: loop body
LE: loop exit
PB: predicated region body
PF: predicated region fallthrough
CT: control target
= control target key end

     0   :  { %7 = vsyncpa [#allocation3], 0  ;;  %s312_s0 = inlined_call_operand.vmem [shape: s32[16,1], index: 0, kind: input, shape index: {}]   ;;  %s313_s1 = inlined_call_operand.hbm [shape: f32[64,128], index: 1, kind: input, shape index: {}]   ;;  %s314_s2 = inlined_call_operand.hbm [shape: f32[16,128], index: 2, kind: output, shape index: {}]  }
   0x1   :  { %8 = vsyncpa [#allocation4], 0  ;;  %s255_s9 = smov [#allocation2]   ;;  %s207_s13 = scalar_lea.hbm %s313_s1, 1024 }
   0x2   :  { %s16_s10 = sshll.u32 %s255_s9, 4  ;;  %p208_p0 = scmp.ne.s32.totalorder %s313_s1, %s207_s13  ;;  %s17_s10 = int_to_ptr.vmem [resolvable:$true] %s16_s10 }
   0x3   :  { %p211_p1 = scmp.lt.u32.totalorder %s207_s13, %s313_s1 }
   0x5   :  { %p213_p2 = pnand %p211_p1, %p208_p0 }
   0x7   :  { %216 = shalt.err (!%p213_p2)
}
   0x8   :  { %s217_s18 = scalar_lea.vmem %s17_s10, 1024  ;;  %p222_p4 = scmp.lt.s32.totalorder %s17_s10, %s17_s10 }
   0x9   :  { %p218_p3 = scmp.ne.s32.totalorder %s17_s10, %s217_s18  ;;  %p223_p5 = scmp.lt.s32.totalorder %s217_s18, %s217_s18 }
   0xb   :  { %p224_p6 = por %p223_p5, %p222_p4 }
   0xd   :  { %p225_p7 = pnand %p224_p6, %p218_p3 }
   0xf   :  { %228 = shalt.err (!%p225_p7)
}
  0x10   :  { %s256_s19 = smov 128   ;;  %s257_s20 = smov 8  }
  0x11   :  { %22 = dma.hbm_to_vmem [thread:$0]  %s313_s1, 1024, %s17_s10, [#allocation3], %s256_s19, %s256_s19, %s257_s20  }
  0x12   :  { %251 = dma.done.wait [#allocation3], 1024  }
  0x13   :  { %252 = vsyncadd [#allocation3], 4294966272  ;;  %v258_v0 = vmov 0   ;;  %v26_v1 = vld [vmem:[%s312_s0] sm:$0xff]  ;;  %v43_v3 = vld [vmem:[#allocation2 + $0x8] sm:$0xff]  ;;  %v28_v15 = vlaneseq  ;;  %vm50_vm0 = vcmask 523264  }
  0x14   :  { %206 = vset.pattern.permute.xlu0 %v258_v0  ;;  %v42_v2 = vld [vmem:[#allocation2] sm:$0xff]  ;;  %v44_v4 = vld [vmem:[#allocation2 + $0x10] sm:$0xff]  ;;  %v45_v5 = vld [vmem:[#allocation2 + $0x18] sm:$0xff]  ;;  %v259_v18 = vmov 0.0  }
  0x15   :  { %31 = vperm.xlu0 %206, %v26_v1   ;;  %v27_v6 = vld [vmem:[%s312_s0 + $0x8] sm:$0xff]  ;;  %v184_v7 = vpack.c.bf16 %v43_v3, %v42_v2  ;;  %v188_v8 = vpack.c.bf16 %v45_v5, %v44_v4  ;;  %v46_v9 = vld [vmem:[#allocation2 + $0x20] sm:$0xff]  ;;  %v48_v12 = vld [vmem:[#allocation2 + $0x30] sm:$0xff]  ;;  %v29_v16 = vand.u32 127, %v28_v15  ;;  %s260_s0 = smov [#allocation5]  }
  0x16   :  { %v47_v10 = vld [vmem:[#allocation2 + $0x28] sm:$0xff]  ;;  %v49_v13 = vld [vmem:[#allocation2 + $0x38] sm:$0xff]  ;;  %s139_s1 = sshll.u32 %s260_s0, 4  ;;  %s140_s1 = int_to_ptr.vmem [resolvable:$true] %s139_s1 }
  0x17   :  { %185 = vmatprep.subr.bf16.mxu0 %v184_v7  ;;  %v192_v11 = vpack.c.bf16 %v47_v10, %v46_v9  ;;  %v196_v14 = vpack.c.bf16 %v49_v13, %v48_v12  ;;  %s229_s27 = scalar_lea.vmem %s140_s1, 256  ;;  %p234_p9 = scmp.lt.s32.totalorder %s140_s1, %s140_s1 }
  0x18   :  { %187 = vmatpush3.bf16.msra.mxu0 %v184_v7  ;;  %p230_p8 = scmp.ne.s32.totalorder %s140_s1, %s229_s27  ;;  %p235_p10 = scmp.lt.s32.totalorder %s229_s27, %s229_s27 }
  0x19   :  { %34 = vperm.xlu0 %206, %v27_v6   ;;  %189 = vmatprep.subr.bf16.mxu0 %v188_v8 }
  0x1a   :  { %p236_p11 = por %p235_p10, %p234_p9 }
  0x1c   :  { %191 = vmatpush3.bf16.msra.mxu0 %v188_v8  ;;  %p237_p12 = pnand %p236_p11, %p230_p8 }
  0x1d   :  { %193 = vmatprep.subr.bf16.mxu0 %v192_v11 }
  0x20   :  { %195 = vmatpush3.bf16.msra.mxu0 %v192_v11 }
  0x21   :  { %197 = vmatprep.subr.bf16.mxu0 %v196_v14 }
  0x24   :  { %199 = vmatpush3.bf16.msra.mxu0 %v196_v14 }
  0x94   :  { %v32_v17 = vpop.permute.xlu0 %31 }
  0x95   :  { %vm36_vm1 = vcmp.eq.s32.totalorder %v29_v16, %v32_v17 }
  0x96   :  { %v151_v19 = vsel %vm36_vm1, 1.0, %v259_v18 }
  0x97   :  { %181 = vmatprep.mubr.msk.f32.mxu0 %vm50_vm0, %v151_v19 }
  0x98   :  { %v35_v20 = vpop.permute.xlu0 %34 }
  0x99   :  { %vm37_vm2 = vcmp.eq.s32.totalorder %v29_v16, %v35_v20 }
  0x9a   :  { %v152_v21 = vsel %vm37_vm2, 1.0, %v259_v18 }
  0x9b   :  { %182 = vmatmul.mubr.msk.f32.vlgmr.msra.gmra.mrb[0].mxu0 %vm50_vm0, %v152_v21 }
 0x16e   :  { %v183_v22 = vpop.f32.mrb[0].mxu0 }
 0x16f   :  { %133 = vst [vmem:[#allocation5 + $0x8] sm:$0xff] %v183_v22  ;;  %v123_v23 = vpop.f32.mrb[1].mxu0 }
 0x170   :  { %132 = vst [vmem:[#allocation5] sm:$0xff] %v123_v23 }
 0x171   :  { %240 = shalt.err (!%p237_p12)
}
 0x172   :  { %s241_s30 = scalar_lea.hbm %s314_s2, 256 }
 0x173   :  { %p242_p13 = scmp.ne.s32.totalorder %s314_s2, %s241_s30  ;;  %p245_p0 = scmp.lt.u32.totalorder %s241_s30, %s314_s2 }
 0x175   :  { %p247_p1 = pnand %p245_p0, %p242_p13 }
 0x177   :  { %250 = shalt.err (!%p247_p1)
}
 0x178   :  { %145 = dma.vmem_to_hbm [thread:$0]  %s140_s1, 256, %s314_s2, [#allocation4], %s256_s19, %s256_s19, %s257_s20  }
 0x179   :  { %253 = dma.done.wait [#allocation4], 256  }
 0x17a   :  { %254 = vsyncadd [#allocation4], 4294967040 }
 0x17b   :  { %149 = vsyncpa [#allocation3], 1 }
 0x17c   :  { %150 = vsyncpa [#allocation4], 1 }

</bundles_post_ra>
